<compile_context>
chip_gen: v7x
topology: tpu7x:2x2x1
jax: 0.10.0
libtpu: 0.0.40
codegen_flags: <defaults>
</compile_context>

<pallas_src>
import jax
import jax.numpy as jnp
from jax import lax
from jax.experimental import pallas as pl
from jax.experimental.pallas import tpu as pltpu

LANES = 128
ACC_SUBLANES = 8              # accumulator tile is an (8, 128) f32 vreg
EPSILON = 1e-07
NUM_CORES = 2                 # leading "parallel" axis: 2 TCs on v7x
DEFAULT_BLOCK_BYTES = 2 * 1024 * 1024   # per input per buffer (~4096 f32 rows)


def _row_align_for_itemsize(itemsize):
    # Minimum sublane tile per dtype width: f32 -> 8, bf16 -> 16, int8/fp8 -> 32.
    return {4: 8, 2: 16, 1: 32}.get(int(itemsize), 8)


def _make_smape_kernel(block_rows, blocks_per_core, total_blocks,
                       valid_rows_in_tail, has_skip):
    """Build the kernel with all tiling decisions baked in as statics."""
    tail_partial = valid_rows_in_tail != block_rows

    def ratio_of(pred_ref, true_ref):
        p = pred_ref[...].astype(jnp.float32)
        t = true_ref[...].astype(jnp.float32)
        diff = jnp.abs(p - t)
        denom = jnp.abs(t) + jnp.abs(p) + jnp.float32(EPSILON)
        # Approx reciprocal on the EUP slot (effectively free next to the VPU
        # work) + one Newton-Raphson step keeps ~full f32 accuracy.
        r0 = pl.reciprocal(denom, approx=True)
        r = r0 * (2.0 - denom * r0)
        return diff * r

    def fold_into(out_ref, ratio):
        # Fold the block onto a single (8,128) vreg tile with VPU adds only;
        # the cross-lane reduction is deferred to the wrapper.
        partial = ratio.reshape(
            block_rows // ACC_SUBLANES, ACC_SUBLANES, LANES).sum(axis=0)
        out_ref[...] += partial.reshape(1, ACC_SUBLANES, LANES)

    def kernel(pred_ref, true_ref, out_ref):
        i = pl.program_id(1)

        @pl.when(i == 0)
        def _():
            out_ref[...] = jnp.zeros_like(out_ref)

        if not tail_partial and not has_skip:
            # Common case: every block is full and no duplicates — zero
            # masking overhead on the bulk streaming path.
            fold_into(out_ref, ratio_of(pred_ref, true_ref))
        else:
            blk = pl.program_id(0) * blocks_per_core + i
            if tail_partial:
                @pl.when(blk < total_blocks - 1)
                def _():
                    fold_into(out_ref, ratio_of(pred_ref, true_ref))

                @pl.when(blk == total_blocks - 1)
                def _():
                    ratio = ratio_of(pred_ref, true_ref)
                    # Local row index vs. a small static count: no int32
                    # overflow regardless of total element count.
                    rid = lax.broadcasted_iota(jnp.int32, ratio.shape, 0)
                    ratio = jnp.where(rid < valid_rows_in_tail, ratio, 0.0)
                    fold_into(out_ref, ratio)
                # blk > total_blocks - 1 (clamped duplicates): skipped.
            else:
                @pl.when(blk < total_blocks)
                def _():
                    fold_into(out_ref, ratio_of(pred_ref, true_ref))
                # blk >= total_blocks (clamped duplicates): skipped.

    return kernel


def smape_loss(y_pred, y_true, *, block_bytes=DEFAULT_BLOCK_BYTES):
    assert y_pred.shape == y_true.shape, "y_pred / y_true shape mismatch"
    n_total = 1
    for d in y_pred.shape:
        n_total *= int(d)
    assert n_total > 0

    pred_flat = jnp.ravel(y_pred)
    true_flat = jnp.ravel(y_true)

    item_p = jnp.dtype(y_pred.dtype).itemsize
    item_t = jnp.dtype(y_true.dtype).itemsize
    row_align = max(_row_align_for_itemsize(item_p),
                    _row_align_for_itemsize(item_t))
    chunk = row_align * LANES
    aligned_n = (n_total // chunk) * chunk

    # Tiny unaligned tail (< row_align*128 elements) handled with plain jnp —
    # avoids a full-tensor jnp.pad copy of both inputs for unaligned sizes.
    if aligned_n < n_total:
        tp = pred_flat[aligned_n:].astype(jnp.float32)
        tt = true_flat[aligned_n:].astype(jnp.float32)
        tail_sum = jnp.sum(
            jnp.abs(tp - tt) / (jnp.abs(tt) + jnp.abs(tp) + jnp.float32(EPSILON)))
    else:
        tail_sum = jnp.float32(0.0)

    if aligned_n == 0:
        # Input smaller than one aligned row-group: nothing for Pallas to do.
        total = tail_sum
    else:
        rows = aligned_n // LANES
        if aligned_n == n_total:
            pred2d = pred_flat.reshape(rows, LANES)   # pure bitcast, no copy
            true2d = true_flat.reshape(rows, LANES)
        else:
            pred2d = pred_flat[:aligned_n].reshape(rows, LANES)
            true2d = true_flat[:aligned_n].reshape(rows, LANES)

        # ---- tiling: large blocks, balanced across (up to) 2 cores --------
        max_item = max(item_p, item_t)
        target_rows = max(row_align,
                          (block_bytes // (LANES * max_item)) // row_align * row_align)
        target_rows = min(target_rows, rows)
        grid_cores = min(NUM_CORES, -(-rows // target_rows))
        blocks_per_core = -(-rows // (grid_cores * target_rows))
        block_rows = -(-rows // (grid_cores * blocks_per_core))
        block_rows = -(-block_rows // row_align) * row_align
        block_rows = min(block_rows, rows)
        total_blocks = -(-rows // block_rows)
        has_skip = grid_cores * blocks_per_core > total_blocks
        valid_rows_in_tail = rows - (total_blocks - 1) * block_rows

        def in_map(c, i):
            blk = c * blocks_per_core + i
            if has_skip:
                # Clamp the (skipped) overhang blocks to valid memory.
                blk = jnp.minimum(blk, total_blocks - 1)
            return (blk, 0)

        # Only bump the scoped-VMEM limit if a caller requested huge tiles;
        # cap below v7x's 64 MiB physical VMEM (safe on v5e/v6e too).
        params = {"dimension_semantics": ("parallel", "arbitrary")}
        vmem_needed = 2 * block_rows * LANES * (item_p + item_t) + (1 << 20)
        if vmem_needed > 12 * (1 << 20):
            params["vmem_limit_bytes"] = int(min(vmem_needed + (4 << 20), 40 << 20))

        kernel = _make_smape_kernel(block_rows, blocks_per_core, total_blocks,
                                    valid_rows_in_tail, has_skip)

        partials = pl.pallas_call(
            kernel,
            out_shape=jax.ShapeDtypeStruct(
                (grid_cores, ACC_SUBLANES, LANES), jnp.float32),
            grid_spec=pltpu.PrefetchScalarGridSpec(
                num_scalar_prefetch=0,
                grid=(grid_cores, blocks_per_core),
                in_specs=[
                    pl.BlockSpec((block_rows, LANES), in_map),
                    pl.BlockSpec((block_rows, LANES), in_map),
                ],
                out_specs=pl.BlockSpec((1, ACC_SUBLANES, LANES),
                                       lambda c, i: (c, 0, 0)),
            ),
            compiler_params=pltpu.CompilerParams(**params),
        )(pred2d, true2d)

        # Tiny final cross-lane reduction (<= 2*8*128 elements) in XLA.
        total = jnp.sum(partials) + tail_sum

    return 2.0 * (total / jnp.float32(n_total)) * 100.0


def smape_ref(y_pred, y_true):
    diff = jnp.abs(y_pred - y_true)
    denom = jnp.abs(y_true) + jnp.abs(y_pred) + EPSILON
    return 2.0 * jnp.mean(diff / denom) * 100.0


if __name__ == "__main__":
    key = jax.random.PRNGKey(0)
    k1, k2, k3, k4, k5, k6 = jax.random.split(key, 6)

    # 1) Aligned NCHW-shaped input (B=2, C=4, H=16, W=16): zero-copy reshape,
    #    single-block single-core path.
    a_pred = jax.random.normal(k1, (2, 4, 16, 16), dtype=jnp.float32)
    a_true = jax.random.normal(k2, (2, 4, 16, 16), dtype=jnp.float32)
    out_a = smape_loss(a_pred, a_true)
    jax.block_until_ready(out_a)
    ref_a = smape_ref(a_pred, a_true)
    assert jnp.allclose(out_a, ref_a, rtol=1e-5, atol=1e-5), (out_a, ref_a)

    # 2) Multi-block path with a partial tail block, 2-way core split and a
    #    skipped clamped duplicate (tiny block_bytes so the small input
    #    exercises the full gating logic).
    b_pred = jax.random.normal(k3, (2, 4, 16, 40), dtype=jnp.float32)
    b_true = jax.random.normal(k4, (2, 4, 16, 40), dtype=jnp.float32)
    out_b = smape_loss(b_pred, b_true, block_bytes=16 * 128 * 4)
    jax.block_until_ready(out_b)
    ref_b = smape_ref(b_pred, b_true)
    assert jnp.allclose(out_b, ref_b, rtol=1e-5, atol=1e-5), (out_b, ref_b)

    # 3) Unaligned element count: Pallas on the aligned prefix + jnp tail.
    c_pred = jax.random.normal(k5, (3, 5, 7, 11), dtype=jnp.float32)
    c_true = jax.random.normal(k6, (3, 5, 7, 11), dtype=jnp.float32)
    out_c = smape_loss(c_pred, c_true)
    jax.block_until_ready(out_c)
    ref_c = smape_ref(c_pred, c_true)
    assert jnp.allclose(out_c, ref_c, rtol=1e-5, atol=1e-5), (out_c, ref_c)

    print("KERNEL_OK")
</pallas_src>

<mosaic_0001>
module attributes {stable_mosaic.version = 11 : i64} {
  func.func @kernel(%arg0: i32, %arg1: i32, %arg2: memref<16x128xf32, #tpu.memory_space<vmem>>, %arg3: memref<16x128xf32, #tpu.memory_space<vmem>>, %arg4: memref<1x8x128xf32, #tpu.memory_space<vmem>>) attributes {dimension_semantics = [#tpu.dimension_semantics<parallel>, #tpu.dimension_semantics<arbitrary>], iteration_bounds = array<i64: 1, 1>, scalar_prefetch = 0 : i64, scratch_operands = 0 : i64, tpu.core_type = #tpu.core_type<tc>, window_params = [{transform_indices = @transform_0, window_bounds = array<i64: 16, 128>}, {transform_indices = @transform_1, window_bounds = array<i64: 16, 128>}, {transform_indices = @transform_2, window_bounds = array<i64: 1, 8, 128>}]} {
    %c0_i32 = arith.constant 0 : i32
    %0 = arith.cmpi eq, %arg1, %c0_i32 : i32
    %1 = arith.extui %0 : i1 to i32
    %c0_i32_0 = arith.constant 0 : i32
    %2 = arith.cmpi ne, %1, %c0_i32_0 : i32
    scf.if %2 {
      %cst_12 = arith.constant 0.000000e+00 : f32
      %24 = vector.broadcast %cst_12 : f32 to vector<1x8x128xf32>
      %c0_13 = arith.constant 0 : index
      %c0_14 = arith.constant 0 : index
      %c0_15 = arith.constant 0 : index
      %25 = vector.load %arg4[%c0_13, %c0_14, %c0_15] : memref<1x8x128xf32, #tpu.memory_space<vmem>>, vector<1x8x128xf32>
      tpu.vector_store %arg4[%c0_13, %c0_14, %c0_15], %24 {strides = array<i32>} : memref<1x8x128xf32, #tpu.memory_space<vmem>>, vector<1x8x128xf32>,
    } else {
    }
    %c0 = arith.constant 0 : index
    %c0_1 = arith.constant 0 : index
    %3 = vector.load %arg2[%c0, %c0_1] : memref<16x128xf32, #tpu.memory_space<vmem>>, vector<16x128xf32>
    %c0_2 = arith.constant 0 : index
    %c0_3 = arith.constant 0 : index
    %4 = vector.load %arg3[%c0_2, %c0_3] : memref<16x128xf32, #tpu.memory_space<vmem>>, vector<16x128xf32>
    %5 = arith.subf %3, %4 : vector<16x128xf32>
    %6 = math.absf %5 : vector<16x128xf32>
    %7 = math.absf %4 : vector<16x128xf32>
    %8 = math.absf %3 : vector<16x128xf32>
    %9 = arith.addf %7, %8 : vector<16x128xf32>
    %cst = arith.constant 1.000000e-07 : f32
    %10 = vector.broadcast %cst : f32 to vector<16x128xf32>
    %11 = arith.addf %9, %10 : vector<16x128xf32>
    %12 = tpu.reciprocal %11 {approx = true} : vector<16x128xf32> -> vector<16x128xf32>
    %13 = arith.mulf %11, %12 : vector<16x128xf32>
    %cst_4 = arith.constant 2.000000e+00 : f32
    %14 = vector.broadcast %cst_4 : f32 to vector<16x128xf32>
    %15 = arith.subf %14, %13 : vector<16x128xf32>
    %16 = arith.mulf %12, %15 : vector<16x128xf32>
    %17 = arith.mulf %6, %16 : vector<16x128xf32>
    %18 = vector.shape_cast %17 : vector<16x128xf32> to vector<2x8x128xf32>
    %cst_5 = arith.constant dense<0.000000e+00> : vector<8x128xf32>
    %19 = vector.multi_reduction <add>, %18, %cst_5 [0] : vector<2x8x128xf32> to vector<8x128xf32>
    %c0_6 = arith.constant 0 : index
    %c0_7 = arith.constant 0 : index
    %c0_8 = arith.constant 0 : index
    %20 = vector.load %arg4[%c0_6, %c0_7, %c0_8] : memref<1x8x128xf32, #tpu.memory_space<vmem>>, vector<1x8x128xf32>
    %21 = vector.shape_cast %19 : vector<8x128xf32> to vector<1x8x128xf32>
    %22 = arith.addf %20, %21 : vector<1x8x128xf32>
    %c0_9 = arith.constant 0 : index
    %c0_10 = arith.constant 0 : index
    %c0_11 = arith.constant 0 : index
    %23 = vector.load %arg4[%c0_9, %c0_10, %c0_11] : memref<1x8x128xf32, #tpu.memory_space<vmem>>, vector<1x8x128xf32>
    tpu.vector_store %arg4[%c0_9, %c0_10, %c0_11], %22 {strides = array<i32>} : memref<1x8x128xf32, #tpu.memory_space<vmem>>, vector<1x8x128xf32>,
    return
  }
  func.func @transform_0(%arg0: i32, %arg1: i32) -> (i32, i32) {
    %c1_i32 = arith.constant 1 : i32
    %0 = arith.muli %arg0, %c1_i32 : i32
    %1 = arith.addi %0, %arg1 : i32
    %c0_i32 = arith.constant 0 : i32
    %c0_i32_0 = arith.constant 0 : i32
    return %1, %c0_i32 : i32, i32
  }
  func.func @transform_1(%arg0: i32, %arg1: i32) -> (i32, i32) {
    %c1_i32 = arith.constant 1 : i32
    %0 = arith.muli %arg0, %c1_i32 : i32
    %1 = arith.addi %0, %arg1 : i32
    %c0_i32 = arith.constant 0 : i32
    %c0_i32_0 = arith.constant 0 : i32
    return %1, %c0_i32 : i32, i32
  }
  func.func @transform_2(%arg0: i32, %arg1: i32) -> (i32, i32, i32) {
    %c0_i32 = arith.constant 0 : i32
    %c0_i32_0 = arith.constant 0 : i32
    %c0_i32_1 = arith.constant 0 : i32
    return %arg0, %c0_i32, %c0_i32_0 : i32, i32, i32
  }
}

</mosaic_0001>

<bundles_post_ra>
// kernel: tpu_custom_call.1
= control target key start
LH: loop header
LB: loop body
LE: loop exit
PB: predicated region body
PF: predicated region fallthrough
CT: control target
= control target key end

     0   :  { %7 = vsyncpa [#allocation3], 0  ;;  %s241_s0 = inlined_call_operand.hbm [shape: f32[16,128], index: 0, kind: input, shape index: {}]   ;;  %s242_s1 = inlined_call_operand.hbm [shape: f32[16,128], index: 1, kind: input, shape index: {}]   ;;  %s243_s2 = inlined_call_operand.hbm [shape: f32[1,8,128], index: 2, kind: output, shape index: {}]  }
   0x1   :  { %8 = vsyncpa [#allocation6], 0 }
   0x2   :  { %9 = vsyncpa [#allocation4], 0  ;;  %s185_s9 = smov [#allocation2]   ;;  %s113_s13 = scalar_lea.hbm %s241_s0, 256 }
   0x3   :  { %s19_s10 = sshll.u32 %s185_s9, 4  ;;  %p114_p0 = scmp.ne.s32.totalorder %s241_s0, %s113_s13  ;;  %s20_s10 = int_to_ptr.vmem [resolvable:$true] %s19_s10 }
   0x4   :  { %p117_p1 = scmp.lt.u32.totalorder %s113_s13, %s241_s0 }
   0x6   :  { %p119_p2 = pnand %p117_p1, %p114_p0 }
   0x8   :  { %122 = shalt.err (!%p119_p2)
}
   0x9   :  { %s123_s18 = scalar_lea.vmem %s20_s10, 256  ;;  %p128_p4 = scmp.lt.s32.totalorder %s20_s10, %s20_s10 }
   0xa   :  { %p124_p3 = scmp.ne.s32.totalorder %s20_s10, %s123_s18  ;;  %p129_p5 = scmp.lt.s32.totalorder %s123_s18, %s123_s18 }
   0xc   :  { %p130_p6 = por %p129_p5, %p128_p4 }
   0xe   :  { %p131_p7 = pnand %p130_p6, %p124_p3 }
  0x10   :  { %134 = shalt.err (!%p131_p7)
}
  0x11   :  { %s186_s19 = smov 128   ;;  %s187_s20 = smov 8  }
  0x12   :  { %25 = dma.hbm_to_vmem [thread:$0]  %s241_s0, 256, %s20_s10, [#allocation3], %s186_s19, %s186_s19, %s187_s20  }
  0x13   :  { %s188_s23 = smov [#allocation5]   ;;  %s135_s27 = scalar_lea.hbm %s242_s1, 256 }
  0x14   :  { %s35_s24 = sshll.u32 %s188_s23, 4  ;;  %p136_p8 = scmp.ne.s32.totalorder %s242_s1, %s135_s27  ;;  %s36_s24 = int_to_ptr.vmem [resolvable:$true] %s35_s24 }
  0x15   :  { %p139_p9 = scmp.lt.u32.totalorder %s135_s27, %s242_s1 }
  0x17   :  { %p141_p10 = pnand %p139_p9, %p136_p8 }
  0x19   :  { %144 = shalt.err (!%p141_p10)
}
  0x1a   :  { %s145_s4 = scalar_lea.vmem %s36_s24, 256  ;;  %p150_p12 = scmp.lt.s32.totalorder %s36_s24, %s36_s24 }
  0x1b   :  { %p146_p11 = scmp.ne.s32.totalorder %s36_s24, %s145_s4  ;;  %p151_p13 = scmp.lt.s32.totalorder %s145_s4, %s145_s4 }
  0x1d   :  { %p152_p0 = por %p151_p13, %p150_p12 }
  0x1f   :  { %p153_p1 = pnand %p152_p0, %p146_p11 }
  0x21   :  { %156 = shalt.err (!%p153_p1)
}
  0x22   :  { %41 = dma.hbm_to_vmem [thread:$0]  %s242_s1, 256, %s36_s24, [#allocation6], %s186_s19, %s186_s19, %s187_s20  }
  0x23   :  { %179 = dma.done.wait [#allocation3], 256  }
  0x24   :  { %180 = vsyncadd [#allocation3], 4294967040 }
  0x25   :  { %181 = dma.done.wait [#allocation6], 256  }
  0x26   :  { %182 = vsyncadd [#allocation6], 4294967040  ;;  %v57_v0 = vld [vmem:[#allocation2] sm:$0xff]  ;;  %v58_v1 = vld [vmem:[#allocation2 + $0x8] sm:$0xff]  ;;  %s189_s1 = smov [#allocation7]  }
  0x27   :  { %v59_v2 = vld [vmem:[#allocation5] sm:$0xff]  ;;  %v60_v3 = vld [vmem:[#allocation5 + $0x8] sm:$0xff]  ;;  %v67_v5 = vand.u32 2147483647, %v57_v0  ;;  %v68_v7 = vand.u32 2147483647, %v58_v1 }
  0x28   :  { %v65_v4 = vand.u32 2147483647, %v59_v2  ;;  %v66_v6 = vand.u32 2147483647, %v60_v3  ;;  %v61_v12 = vsub.f32 %v57_v0, %v59_v2  ;;  %v62_v14 = vsub.f32 %v58_v1, %v60_v3  ;;  %s93_s6 = sshll.u32 %s189_s1, 4  ;;  %s94_s6 = int_to_ptr.vmem [resolvable:$true] %s93_s6 }
  0x29   :  { %s157_s7 = scalar_lea.vmem %s94_s6, 128  ;;  %p162_p3 = scmp.lt.s32.totalorder %s94_s6, %s94_s6 }
  0x2a   :  { %v69_v8 = vadd.f32 %v67_v5, %v65_v4  ;;  %v70_v9 = vadd.f32 %v68_v7, %v66_v6  ;;  %v63_v18 = vand.u32 2147483647, %v61_v12  ;;  %v64_v20 = vand.u32 2147483647, %v62_v14  ;;  %p158_p2 = scmp.ne.s32.totalorder %s94_s6, %s157_s7  ;;  %p163_p4 = scmp.lt.s32.totalorder %s157_s7, %s157_s7 }
  0x2c   :  { %v71_v10 = vadd.f32 1e-07, %v69_v8  ;;  %v72_v11 = vadd.f32 1e-07, %v70_v9  ;;  %p164_p5 = por %p163_p4, %p162_p3 }
  0x2e   :  { %109 = vrcp.f32 %v71_v10  ;;  %p165_p6 = pnand %p164_p5, %p158_p2 }
  0x2f   :  { %111 = vrcp.f32 %v72_v11 }
  0x38   :  { %v110_v13 = vpop.eup %109 }
  0x39   :  { %v112_v15 = vpop.eup %111  ;;  %v75_v16 = vmul.f32 %v110_v13, %v71_v10 }
  0x3a   :  { %v76_v17 = vmul.f32 %v112_v15, %v72_v11 }
  0x3b   :  { %v77_v19 = vsub.f32 2.0, %v75_v16 }
  0x3c   :  { %v78_v21 = vsub.f32 2.0, %v76_v17 }
  0x3d   :  { %v79_v22 = vmul.f32 %v110_v13, %v77_v19 }
  0x3e   :  { %v80_v23 = vmul.f32 %v112_v15, %v78_v21 }
  0x3f   :  { %v81_v24 = vmul.f32 %v79_v22, %v63_v18 }
  0x40   :  { %v82_v25 = vmul.f32 %v80_v23, %v64_v20 }
  0x42   :  { %v83_v26 = vadd.f32 %v82_v25, %v81_v24 }
  0x44   :  { %86 = vst [vmem:[#allocation7] sm:$0xff] %v83_v26 }
  0x45   :  { %168 = shalt.err (!%p165_p6)
}
  0x46   :  { %s169_s10 = scalar_lea.hbm %s243_s2, 128 }
  0x47   :  { %p170_p7 = scmp.ne.s32.totalorder %s243_s2, %s169_s10  ;;  %p173_p8 = scmp.lt.u32.totalorder %s169_s10, %s243_s2 }
  0x49   :  { %p175_p9 = pnand %p173_p8, %p170_p7 }
  0x4b   :  { %178 = shalt.err (!%p175_p9)
}
  0x4c   :  { %96 = dma.vmem_to_hbm [thread:$0]  %s94_s6, 128, %s243_s2, [#allocation4]  }
  0x4d   :  { %183 = dma.done.wait [#allocation4], 128  }
  0x4e   :  { %184 = vsyncadd [#allocation4], 4294967168 }
  0x4f   :  { %100 = vsyncpa [#allocation3], 1 }
  0x50   :  { %101 = vsyncpa [#allocation6], 1 }
  0x51   :  { %102 = vsyncpa [#allocation4], 1 }

</bundles_post_ra>
